<compile_context>
chip_gen: v5e
topology: v5e:2x2
jax: 0.10.0
libtpu: 0.0.40
codegen_flags: <defaults>
</compile_context>

<pallas_src>
import functools

import jax
import jax.numpy as jnp
from jax.experimental import pallas as pl
from jax.experimental.pallas import tpu as pltpu


def _round_up(x, m):
    return ((x + m - 1) // m) * m


def _vmem_capacity_bytes():
    """Physical VMEM per TensorCore; conservative fallback = v7x (64 MiB)."""
    try:
        return int(pltpu.get_tpu_info().vmem_capacity_bytes)
    except Exception:
        return 64 * 1024 * 1024


def _focal_loss_kernel(preds_ref, labels_ref, alpha_ref, out_ref, *, gamma):
    t_id = pl.program_id(1)

    # Resident-output accumulator across the sequential tile axis.
    @pl.when(t_id == 0)
    def _():
        out_ref[...] = jnp.zeros_like(out_ref)

    x = preds_ref[...].astype(jnp.float32)      # (C, ts, 128)
    labels = labels_ref[...]                    # (ts, 128) int32; padded cols hold C
    alpha = alpha_ref[...].astype(jnp.float32)  # (C, 1)

    C = preds_ref.shape[0]

    # Numerically-stable log-softmax pieces over the (small, unrolled) class axis.
    m = x[0]
    for c in range(1, C):
        m = jnp.maximum(m, x[c])
    s = jnp.exp(x[0] - m)
    for c in range(1, C):
        s = s + jnp.exp(x[c] - m)

    # Gather x[label] and alpha[label] with select chains. Padded label columns
    # carry the out-of-range id C, so they match nothing and a_t stays 0 there
    # -> padded samples contribute exactly zero (no explicit mask needed).
    x_t = jnp.zeros_like(m)
    a_t = jnp.zeros_like(m)
    for c in range(C):
        match = labels == c
        x_t = jnp.where(match, x[c], x_t)
        a_t = jnp.where(match, alpha[c:c + 1, :], a_t)

    logp_t = (x_t - m) - jnp.log(s)     # log softmax at the label
    p_t = jnp.exp(logp_t)               # softmax at the label (EUP, slack slot)

    g = float(gamma)
    if g.is_integer() and g >= 0:
        # Integer-gamma fast path: VPU multiply chain, no clamp, no EUP pow.
        e = int(g)
        if e == 0:
            focal = jnp.ones_like(p_t)
        else:
            base = 1.0 - p_t
            focal = base
            for _ in range(e - 1):
                focal = focal * base
    else:
        base = jnp.maximum(1.0 - p_t, 0.0)
        focal = jnp.exp(g * jnp.log(base))

    loss = -(a_t * focal * logp_t)      # (ts, 128) per-sample loss

    # Tree-reduce the tile to a single (8, 128) partial and accumulate into the
    # resident output block (final reduce-to-scalar happens in the wrapper).
    ts = loss.shape[0]
    partial = loss[0:8]
    for i in range(1, ts // 8):
        partial = partial + loss[8 * i:8 * (i + 1)]
    out_ref[...] += partial


def focal_loss_pallas(preds, labels, alpha_vec, gamma=2.0, size_average=False,
                      num_parallel_splits=1, max_samples_per_tile=128 * 1024,
                      vmem_budget_bytes=None):
    """preds: [..., C] float, labels: [...] int, alpha_vec: [C] float."""
    C = preds.shape[-1]
    x = preds.reshape(-1, C)                 # keep input dtype (bf16 stays bf16)
    M = x.shape[0]
    y = labels.reshape(-1).astype(jnp.int32)

    # v5e/v6e have a single TensorCore: default to no split (it would only add
    # grid bookkeeping + padding). On v7x pass num_parallel_splits=2 to shard
    # the sample axis across both TensorCores via CORE_PARALLEL.
    P = max(1, int(num_parallel_splits))

    vmem_cap = _vmem_capacity_bytes()
    if vmem_budget_bytes is None:
        # ~21 MiB working-set budget on v7x (64 MiB/TC), ~40 MiB on v5e/v6e.
        vmem_budget_bytes = min(vmem_cap // 3, 40 * 1024 * 1024)

    CHUNK = 8 * 128                          # sample granularity: one vreg plane
    itemsize = jnp.dtype(preds.dtype).itemsize
    # Double-buffered preds + labels tiles dominate VMEM use.
    bytes_per_sample = 2 * (C * itemsize + 4)
    cap_samples = max(CHUNK,
                      (vmem_budget_bytes // bytes_per_sample) // CHUNK * CHUNK)
    max_tile = max(CHUNK, min(int(max_samples_per_tile), cap_samples))

    per_split = -(-M // P)
    if per_split <= max_tile:
        tile = _round_up(per_split, CHUNK)
    else:
        n_t = -(-per_split // max_tile)              # balanced tile count
        tile = _round_up(-(-per_split // n_t), CHUNK)
    tile = min(tile, max_tile)

    Mp = _round_up(M, P * tile)
    T = Mp // (P * tile)
    ts = tile // 128
    R = Mp // 128

    # TODO(synk): ideally the upstream producer emits logits already laid out
    # as [C, M] (fused into its matmul epilogue) so this pad+transpose HBM pass
    # disappears; it is kept so the wrapper accepts the module's [..., C] input.
    x_pad = jnp.pad(x, ((0, Mp - M), (0, 0)))
    preds_t = x_pad.T.reshape(C, R, 128)                       # [C, R, 128]
    # Pad labels with the out-of-range class id C -> zero contribution.
    labels_p = jnp.pad(y, (0, Mp - M), constant_values=C).reshape(R, 128)
    alpha2d = jnp.asarray(alpha_vec, jnp.float32).reshape(C, 1)

    kernel = functools.partial(_focal_loss_kernel, gamma=float(gamma))

    dim_sems = ((pltpu.CORE_PARALLEL if P > 1 else "parallel"), "arbitrary")

    out = pl.pallas_call(
        kernel,
        out_shape=jax.ShapeDtypeStruct((P * 8, 128), jnp.float32),
        grid_spec=pltpu.PrefetchScalarGridSpec(
            num_scalar_prefetch=0,
            grid=(P, T),
            in_specs=[
                pl.BlockSpec((C, ts, 128), lambda p, t: (0, p * T + t, 0)),
                pl.BlockSpec((ts, 128), lambda p, t: (p * T + t, 0)),
                pl.BlockSpec((C, 1), lambda p, t: (0, 0)),
            ],
            out_specs=pl.BlockSpec((8, 128), lambda p, t: (p, 0)),
        ),
        compiler_params=pltpu.CompilerParams(
            # p splits samples across TensorCores (opt-in, v7x); t carries the
            # resident-output accumulation so it must stay sequential.
            dimension_semantics=dim_sems,
            vmem_limit_bytes=int(min(vmem_cap * 3 // 4, 96 * 1024 * 1024)),
        ),
    )(preds_t, labels_p, alpha2d)

    loss = jnp.sum(out)
    if size_average:
        loss = loss / jnp.float32(M)
    return loss


def focal_loss_ref(preds, labels, alpha_vec, gamma=2.0, size_average=False):
    """Pure-JAX reference matching the PyTorch module semantics."""
    C = preds.shape[-1]
    x = preds.reshape(-1, C).astype(jnp.float32)
    yy = labels.reshape(-1)
    p = jax.nn.softmax(x, axis=1)
    logp = jnp.log(p)
    p_t = jnp.take_along_axis(p, yy[:, None], axis=1)[:, 0]
    logp_t = jnp.take_along_axis(logp, yy[:, None], axis=1)[:, 0]
    a_t = jnp.asarray(alpha_vec, jnp.float32)[yy]
    loss = -a_t * jnp.power(1.0 - p_t, gamma) * logp_t
    return loss.mean() if size_average else loss.sum()


if __name__ == "__main__":
    key = jax.random.PRNGKey(0)
    k1, k2, k3, k4, k5, k6 = jax.random.split(key, 6)

    # Case 1: FocalLoss(alpha=0.25, gamma=2, num_classes=2, size_average=False)
    alpha_const, gamma, num_classes = 0.25, 2.0, 2
    alpha_vec = jnp.concatenate([
        jnp.array([alpha_const], jnp.float32),
        jnp.full((num_classes - 1,), 1.0 - alpha_const, jnp.float32),
    ])
    preds = jax.random.normal(k1, (2, 8, num_classes), dtype=jnp.float32)
    labels = jax.random.randint(k2, (2, 8), 0, num_classes, dtype=jnp.int32)

    loss = jax.block_until_ready(
        focal_loss_pallas(preds, labels, alpha_vec, gamma=gamma,
                          size_average=False))
    ref = focal_loss_ref(preds, labels, alpha_vec, gamma=gamma,
                         size_average=False)
    assert jnp.allclose(loss, ref, rtol=1e-5, atol=1e-5), (loss, ref)

    # Case 2: list-style alpha, size_average=True, tiny M with padded tail.
    alpha_vec2 = jnp.array([0.2, 0.3, 0.5], jnp.float32)
    preds2 = jax.random.normal(k3, (2, 5, 3), dtype=jnp.float32)
    labels2 = jax.random.randint(k4, (2, 5), 0, 3, dtype=jnp.int32)

    loss2 = jax.block_until_ready(
        focal_loss_pallas(preds2, labels2, alpha_vec2, gamma=gamma,
                          size_average=True))
    ref2 = focal_loss_ref(preds2, labels2, alpha_vec2, gamma=gamma,
                          size_average=True)
    assert jnp.allclose(loss2, ref2, rtol=1e-5, atol=1e-5), (loss2, ref2)

    # Case 3: forces the multi-tile accumulation path (T > 1) + padded labels.
    preds3 = jax.random.normal(k5, (4, 600, 3), dtype=jnp.float32)
    labels3 = jax.random.randint(k6, (4, 600), 0, 3, dtype=jnp.int32)

    loss3 = jax.block_until_ready(
        focal_loss_pallas(preds3, labels3, alpha_vec2, gamma=gamma,
                          size_average=False, max_samples_per_tile=1024))
    ref3 = focal_loss_ref(preds3, labels3, alpha_vec2, gamma=gamma,
                          size_average=False)
    assert jnp.allclose(loss3, ref3, rtol=1e-4, atol=1e-4), (loss3, ref3)

    print("KERNEL_OK")
</pallas_src>

<mosaic_0001>
module attributes {stable_mosaic.version = 11 : i64} {
  func.func @_focal_loss_kernel(%arg0: i32, %arg1: i32, %arg2: memref<2x8x128xf32, #tpu.memory_space<vmem>>, %arg3: memref<8x128xi32, #tpu.memory_space<vmem>>, %arg4: memref<2x1xf32, #tpu.memory_space<vmem>>, %arg5: memref<8x128xf32, #tpu.memory_space<vmem>>) attributes {dimension_semantics = [#tpu.dimension_semantics<parallel>, #tpu.dimension_semantics<arbitrary>], iteration_bounds = array<i64: 1, 1>, scalar_prefetch = 0 : i64, scratch_operands = 0 : i64, tpu.core_type = #tpu.core_type<tc>, window_params = [{transform_indices = @transform_0, window_bounds = array<i64: 2, 8, 128>}, {transform_indices = @transform_1, window_bounds = array<i64: 8, 128>}, {pipeline_mode = #tpu.pipeline_mode<synchronous>, transform_indices = @transform_2, window_bounds = array<i64: 2, 1>}, {transform_indices = @transform_3, window_bounds = array<i64: 8, 128>}]} {
    %c0_i32 = arith.constant 0 : i32
    %0 = arith.cmpi eq, %arg1, %c0_i32 : i32
    %1 = arith.extui %0 : i1 to i32
    %c0_i32_0 = arith.constant 0 : i32
    %2 = arith.cmpi ne, %1, %c0_i32_0 : i32
    scf.if %2 {
      %cst_15 = arith.constant 0.000000e+00 : f32
      %54 = vector.broadcast %cst_15 : f32 to vector<8x128xf32>
      %c0_16 = arith.constant 0 : index
      %c0_17 = arith.constant 0 : index
      %55 = vector.load %arg5[%c0_16, %c0_17] : memref<8x128xf32, #tpu.memory_space<vmem>>, vector<8x128xf32>
      tpu.vector_store %arg5[%c0_16, %c0_17], %54 {strides = array<i32>} : memref<8x128xf32, #tpu.memory_space<vmem>>, vector<8x128xf32>,
    } else {
    }
    %c0 = arith.constant 0 : index
    %c0_1 = arith.constant 0 : index
    %c0_2 = arith.constant 0 : index
    %3 = vector.load %arg2[%c0, %c0_1, %c0_2] : memref<2x8x128xf32, #tpu.memory_space<vmem>>, vector<2x8x128xf32>
    %c0_3 = arith.constant 0 : index
    %c0_4 = arith.constant 0 : index
    %4 = vector.load %arg3[%c0_3, %c0_4] : memref<8x128xi32, #tpu.memory_space<vmem>>, vector<8x128xi32>
    %c0_5 = arith.constant 0 : index
    %c0_6 = arith.constant 0 : index
    %5 = vector.load %arg4[%c0_5, %c0_6] : memref<2x1xf32, #tpu.memory_space<vmem>>, vector<2x1xf32>
    %6 = vector.extract_strided_slice %3 {offsets = [0, 0, 0], sizes = [1, 8, 128], strides = [1, 1, 1]} : vector<2x8x128xf32> to vector<1x8x128xf32>
    %7 = vector.shape_cast %6 : vector<1x8x128xf32> to vector<8x128xf32>
    %8 = vector.extract_strided_slice %3 {offsets = [1, 0, 0], sizes = [1, 8, 128], strides = [1, 1, 1]} : vector<2x8x128xf32> to vector<1x8x128xf32>
    %9 = vector.shape_cast %8 : vector<1x8x128xf32> to vector<8x128xf32>
    %10 = arith.maximumf %7, %9 : vector<8x128xf32>
    %11 = vector.extract_strided_slice %3 {offsets = [0, 0, 0], sizes = [1, 8, 128], strides = [1, 1, 1]} : vector<2x8x128xf32> to vector<1x8x128xf32>
    %12 = vector.shape_cast %11 : vector<1x8x128xf32> to vector<8x128xf32>
    %13 = arith.subf %12, %10 : vector<8x128xf32>
    %14 = math.exp %13 : vector<8x128xf32>
    %15 = vector.extract_strided_slice %3 {offsets = [1, 0, 0], sizes = [1, 8, 128], strides = [1, 1, 1]} : vector<2x8x128xf32> to vector<1x8x128xf32>
    %16 = vector.shape_cast %15 : vector<1x8x128xf32> to vector<8x128xf32>
    %17 = arith.subf %16, %10 : vector<8x128xf32>
    %18 = math.exp %17 : vector<8x128xf32>
    %19 = arith.addf %14, %18 : vector<8x128xf32>
    %cst = arith.constant 0.000000e+00 : f32
    %20 = vector.broadcast %cst : f32 to vector<8x128xf32>
    %cst_7 = arith.constant 0.000000e+00 : f32
    %21 = vector.broadcast %cst_7 : f32 to vector<8x128xf32>
    %c0_i32_8 = arith.constant 0 : i32
    %22 = vector.broadcast %c0_i32_8 : i32 to vector<8x128xi32>
    %23 = arith.cmpi eq, %4, %22 : vector<8x128xi32>
    %24 = vector.extract_strided_slice %3 {offsets = [0, 0, 0], sizes = [1, 8, 128], strides = [1, 1, 1]} : vector<2x8x128xf32> to vector<1x8x128xf32>
    %25 = vector.shape_cast %24 : vector<1x8x128xf32> to vector<8x128xf32>
    %26 = arith.select %23, %25, %20 : vector<8x128xi1>, vector<8x128xf32>
    %27 = vector.extract_strided_slice %5 {offsets = [0, 0], sizes = [1, 1], strides = [1, 1]} : vector<2x1xf32> to vector<1x1xf32>
    %28 = vector.shape_cast %27 : vector<1x1xf32> to vector<1x1xf32>
    %29 = vector.broadcast %28 : vector<1x1xf32> to vector<8x128xf32>
    %30 = arith.select %23, %29, %21 : vector<8x128xi1>, vector<8x128xf32>
    %c1_i32 = arith.constant 1 : i32
    %31 = vector.broadcast %c1_i32 : i32 to vector<8x128xi32>
    %32 = arith.cmpi eq, %4, %31 : vector<8x128xi32>
    %33 = vector.extract_strided_slice %3 {offsets = [1, 0, 0], sizes = [1, 8, 128], strides = [1, 1, 1]} : vector<2x8x128xf32> to vector<1x8x128xf32>
    %34 = vector.shape_cast %33 : vector<1x8x128xf32> to vector<8x128xf32>
    %35 = arith.select %32, %34, %26 : vector<8x128xi1>, vector<8x128xf32>
    %36 = vector.extract_strided_slice %5 {offsets = [1, 0], sizes = [1, 1], strides = [1, 1]} : vector<2x1xf32> to vector<1x1xf32>
    %37 = vector.shape_cast %36 : vector<1x1xf32> to vector<1x1xf32>
    %38 = vector.broadcast %37 : vector<1x1xf32> to vector<8x128xf32>
    %39 = arith.select %32, %38, %30 : vector<8x128xi1>, vector<8x128xf32>
    %40 = arith.subf %35, %10 : vector<8x128xf32>
    %41 = math.log %19 : vector<8x128xf32>
    %42 = arith.subf %40, %41 : vector<8x128xf32>
    %43 = math.exp %42 : vector<8x128xf32>
    %cst_9 = arith.constant 1.000000e+00 : f32
    %44 = vector.broadcast %cst_9 : f32 to vector<8x128xf32>
    %45 = arith.subf %44, %43 : vector<8x128xf32>
    %46 = arith.mulf %45, %45 : vector<8x128xf32>
    %47 = arith.mulf %39, %46 : vector<8x128xf32>
    %48 = arith.mulf %47, %42 : vector<8x128xf32>
    %cst_10 = arith.constant 0.000000e+00 : f32
    %49 = vector.broadcast %cst_10 : f32 to vector<8x128xf32>
    %50 = arith.subf %49, %48 : vector<8x128xf32>
    %c0_11 = arith.constant 0 : index
    %c0_12 = arith.constant 0 : index
    %51 = vector.load %arg5[%c0_11, %c0_12] : memref<8x128xf32, #tpu.memory_space<vmem>>, vector<8x128xf32>
    %52 = arith.addf %51, %50 : vector<8x128xf32>
    %c0_13 = arith.constant 0 : index
    %c0_14 = arith.constant 0 : index
    %53 = vector.load %arg5[%c0_13, %c0_14] : memref<8x128xf32, #tpu.memory_space<vmem>>, vector<8x128xf32>
    tpu.vector_store %arg5[%c0_13, %c0_14], %52 {strides = array<i32>} : memref<8x128xf32, #tpu.memory_space<vmem>>, vector<8x128xf32>,
    return
  }
  func.func @transform_0(%arg0: i32, %arg1: i32) -> (i32, i32, i32) {
    %c1_i32 = arith.constant 1 : i32
    %0 = arith.muli %arg0, %c1_i32 : i32
    %1 = arith.addi %0, %arg1 : i32
    %c0_i32 = arith.constant 0 : i32
    %c0_i32_0 = arith.constant 0 : i32
    %c0_i32_1 = arith.constant 0 : i32
    return %c0_i32, %1, %c0_i32_0 : i32, i32, i32
  }
  func.func @transform_1(%arg0: i32, %arg1: i32) -> (i32, i32) {
    %c1_i32 = arith.constant 1 : i32
    %0 = arith.muli %arg0, %c1_i32 : i32
    %1 = arith.addi %0, %arg1 : i32
    %c0_i32 = arith.constant 0 : i32
    %c0_i32_0 = arith.constant 0 : i32
    return %1, %c0_i32 : i32, i32
  }
  func.func @transform_2(%arg0: i32, %arg1: i32) -> (i32, i32) {
    %c0_i32 = arith.constant 0 : i32
    %c0_i32_0 = arith.constant 0 : i32
    %c0_i32_1 = arith.constant 0 : i32
    return %c0_i32, %c0_i32_0 : i32, i32
  }
  func.func @transform_3(%arg0: i32, %arg1: i32) -> (i32, i32) {
    %c0_i32 = arith.constant 0 : i32
    %c0_i32_0 = arith.constant 0 : i32
    return %arg0, %c0_i32 : i32, i32
  }
}

</mosaic_0001>

<bundles_post_ra>
// kernel: tpu_custom_call.1
= control target key start
LH: loop header
LB: loop body
LE: loop exit
PB: predicated region body
PF: predicated region fallthrough
CT: control target
= control target key end

     0   :  { %8 = vsyncpa [#allocation3], 0  ;;  %s253_s0 = inlined_call_operand.hbm [shape: f32[2,8,128], index: 0, kind: input, shape index: {}]   ;;  %s254_s1 = inlined_call_operand.hbm [shape: s32[8,128], index: 1, kind: input, shape index: {}]   ;;  %s255_s2 = inlined_call_operand.vmem [shape: f32[2,1], index: 2, kind: input, shape index: {}]   ;;  %s256_s3 = inlined_call_operand.hbm [shape: f32[8,128], index: 3, kind: output, shape index: {}]  }
   0x1   :  { %9 = vsyncpa [#allocation6], 0 }
   0x2   :  { %10 = vsyncpa [#allocation4], 0  ;;  %s18_s14 = sshll.u32 %s253_s0, 4  ;;  %s212_s15 = smov [#allocation2]   ;;  %s19_s14 = int_to_ptr.hbm [resolvable:$true] %s18_s14 }
   0x3   :  { %s20_s16 = sshll.u32 %s212_s15, 4  ;;  %s35_s19 = sshll.u32 %s254_s1, 4  ;;  %s21_s16 = int_to_ptr.vmem [resolvable:$true] %s20_s16  ;;  %s36_s19 = int_to_ptr.hbm [resolvable:$true] %s35_s19 }
   0x4   :  { %s213_s20 = smov 128   ;;  %s214_s21 = smov 8  }
   0x5   :  { %26 = dma.hbm_to_vmem [thread:$0]  %s19_s14, 256, %s21_s16, [#allocation3], %s213_s20, %s213_s20, %s214_s21  }
   0x6   :  { %s215_s22 = smov [#allocation5]  }
   0x7   :  { %s37_s23 = sshll.u32 %s215_s22, 4  ;;  %s38_s23 = int_to_ptr.vmem [resolvable:$true] %s37_s23 }
   0x8   :  { %40 = dma.hbm_to_vmem [thread:$0]  %s36_s19, 128, %s38_s23, [#allocation6]  }
   0x9   :  { %206 = dma.done.wait [#allocation3], 256  }
   0xa   :  { %207 = vsyncadd [#allocation3], 4294967040 }
   0xb   :  { %208 = dma.done.wait [#allocation6], 128  }
   0xc   :  { %209 = vsyncadd [#allocation6], 4294967168  ;;  %v61_v0 = vld [vmem:[%s255_s2] sm:$0x3]  ;;  %v59_v2 = vld [vmem:[#allocation2 + $0x8] sm:$0xff]  ;;  %s216_s25 = smov [#allocation7]  }
   0xd   :  { %v58_v1 = vld [vmem:[#allocation2] sm:$0xff]  ;;  %116 = vpush %v61_v0  ;;  %v79_v3 = vrot.slane %v61_v0, 1  ;;  %v60_v11 = vld [vmem:[#allocation5] sm:$0xff]  ;;  %s103_s26 = sshll.u32 %s216_s25, 4  ;;  %s105_s29 = sshll.u32 %s256_s3, 4  ;;  %s104_s26 = int_to_ptr.vmem [resolvable:$true] %s103_s26  ;;  %s106_s29 = int_to_ptr.hbm [resolvable:$true] %s105_s29 }
   0xe   :  { %v62_v4 = vmax.f32 %v58_v1, %v59_v2  ;;  %vm70_vm0 = vcmp.eq.s32.totalorder %v60_v11, 0  ;;  %vm77_vm1 = vcmp.eq.s32.totalorder %v60_v11, 1 }
   0xf   :  { %118 = vpush %v79_v3  ;;  %v71_v13 = vsel %vm70_vm0, %v58_v1, 0.0 }
  0x10   :  { %v63_v5 = vsub.f32 %v58_v1, %v62_v4  ;;  %v66_v6 = vsub.f32 %v59_v2, %v62_v4  ;;  %v78_v15 = vsel %vm77_vm1, %v59_v2, %v71_v13 }
  0x11   :  { %v84_v16 = vsub.f32 %v78_v15, %v62_v4 }
  0x12   :  { %v64_v7 = vmul.f32 1.442695, %v63_v5  ;;  %v67_v8 = vmul.f32 1.442695, %v66_v6 }
  0x14   :  { %126 = vpow2.f32 %v64_v7 }
  0x15   :  { %128 = vpow2.f32 %v67_v8 }
  0x1a   :  { %v127_v9 = vpop.eup %126 }
  0x1b   :  { %v129_v10 = vpop.eup %128 }
  0x1c   :  { %v69_v12 = vadd.f32 %v129_v10, %v127_v9 }
  0x1e   :  { %130 = vlog2.f32 %v69_v12 }
  0x24   :  { %v131_v14 = vpop.eup %130 }
  0x25   :  { %v86_v17 = vmul.f32 0.6931472, %v131_v14 }
  0x27   :  { %v87_v18 = vsub.f32 %v84_v16, %v86_v17 }
  0x29   :  { %v88_v19 = vmul.f32 1.442695, %v87_v18 }
  0x2b   :  { %132 = vpow2.f32 %v88_v19 }
  0x31   :  { %v133_v20 = vpop.eup %132 }
  0x32   :  { %v90_v21 = vsub.f32 1.0, %v133_v20 }
  0x34   :  { %v91_v23 = vmul.f32 %v90_v21, %v90_v21 }
  0x3e   :  { %s117_s1 = spop %116 }
  0x3f   :  { %v74_v22 = vstv %s117_s1 }
  0x40   :  { %v76_v24 = vsel %vm70_vm0, %v74_v22, 0.0  ;;  %s119_s2 = spop %118 }
  0x41   :  { %v81_v25 = vstv %s119_s2 }
  0x42   :  { %v83_v26 = vsel %vm77_vm1, %v81_v25, %v76_v24 }
  0x43   :  { %v92_v27 = vmul.f32 %v91_v23, %v83_v26 }
  0x45   :  { %v93_v28 = vmul.f32 %v92_v27, %v87_v18 }
  0x47   :  { %v94_v29 = vsub.f32 0.0, %v93_v28 }
  0x49   :  { %97 = vst [vmem:[#allocation7] sm:$0xff] %v94_v29 }
  0x4a   :  { %108 = dma.vmem_to_hbm [thread:$0]  %s104_s26, 128, %s106_s29, [#allocation4]  }
  0x4b   :  { %210 = dma.done.wait [#allocation4], 128  }
  0x4c   :  { %211 = vsyncadd [#allocation4], 4294967168 }
  0x4d   :  { %113 = vsyncpa [#allocation3], 1 }
  0x4e   :  { %114 = vsyncpa [#allocation6], 1 }
  0x4f   :  { %115 = vsyncpa [#allocation4], 1 }

</bundles_post_ra>
